<compile_context>
chip_gen: v6e
topology: v6e:2x2x1
jax: 0.10.0
libtpu: 0.0.40
codegen_flags: <defaults>
</compile_context>

<pallas_src>
import jax
import jax.numpy as jnp
from jax.experimental import pallas as pl
from jax.experimental.pallas import tpu as pltpu


def _cheb_kernel(x_ref, xk_ref, xk1_ref, o_ref):
    # VPU hot path: I_{n+1} = 2 * x * I_n - I_{n-1}
    o_ref[...] = 2.0 * x_ref[...] * xk_ref[...] - xk1_ref[...]


# ~2 MiB per ref -> (3 in + 1 out) x 2 buffers = 16 MiB double-buffered VMEM.
_TARGET_BLOCK_BYTES = 2 * 1024 * 1024


def _choose_lanes(n):
    """Widest lane-dense last dim that divides n exactly (no padding)."""
    for lanes in (4096, 2048, 1024, 512, 256, 128):
        if n % lanes == 0:
            return lanes, False
    # n not a multiple of 128: fall back to padding to a wide lane width.
    return 1024, True


def chebyshev_pol(x, xk, xk1):
    assert x.shape == xk.shape == xk1.shape
    assert x.dtype == xk.dtype == xk1.dtype
    orig_shape = x.shape
    dtype = x.dtype
    n = x.size
    itemsize = jnp.dtype(dtype).itemsize

    lanes, need_pad = _choose_lanes(n)
    n_pad = ((n + lanes - 1) // lanes) * lanes if need_pad else n
    rows = n_pad // lanes

    def prep(a):
        a = a.reshape(-1)
        if need_pad:
            a = jnp.pad(a, (0, n_pad - n))
        return a.reshape(rows, lanes)

    x2, xk2, xk12 = prep(x), prep(xk), prep(xk1)

    # Block rows: ~2 MiB per ref; multiple of 8 (sublane) or the full row dim.
    block_rows = max(1, _TARGET_BLOCK_BYTES // (lanes * itemsize))
    if block_rows >= rows:
        block_rows = rows            # full dim -> always a legal block
    else:
        block_rows = max(8, (block_rows // 8) * 8)

    grid = (pl.cdiv(rows, block_rows),)
    spec = pl.BlockSpec((block_rows, lanes), lambda i: (i, 0))

    out = pl.pallas_call(
        _cheb_kernel,
        out_shape=jax.ShapeDtypeStruct((rows, lanes), dtype),
        grid=grid,
        in_specs=[spec, spec, spec],
        out_specs=spec,
        compiler_params=pltpu.CompilerParams(
            dimension_semantics=("parallel",),
        ),
    )(x2, xk2, xk12)

    if need_pad:
        out = out.reshape(-1)[:n]
    return out.reshape(orig_shape)


if __name__ == "__main__":
    key = jax.random.PRNGKey(0)
    k1, k2, k3, k4, k5, k6 = jax.random.split(key, 6)

    # Main test: small NCHW-shaped f32 inputs (batch=2, channels=4, spatial=16x16).
    shape = (2, 4, 16, 16)
    x = jax.random.normal(k1, shape, dtype=jnp.float32)
    xk = jax.random.normal(k2, shape, dtype=jnp.float32)
    xk1 = jax.random.normal(k3, shape, dtype=jnp.float32)

    out = chebyshev_pol(x, xk, xk1)
    out = jax.block_until_ready(out)
    ref = 2.0 * x * xk - xk1
    assert out.shape == shape
    assert out.dtype == x.dtype
    assert jnp.allclose(out, ref, atol=1e-6, rtol=1e-6)

    # Secondary test: size not divisible by 128 (exercises the padded path).
    shape2 = (3, 5, 7)
    a = jax.random.normal(k4, shape2, dtype=jnp.float32)
    b = jax.random.normal(k5, shape2, dtype=jnp.float32)
    c = jax.random.normal(k6, shape2, dtype=jnp.float32)
    out2 = jax.block_until_ready(chebyshev_pol(a, b, c))
    ref2 = 2.0 * a * b - c
    assert out2.shape == shape2
    assert jnp.allclose(out2, ref2, atol=1e-6, rtol=1e-6)

    # Dtype check: bf16 stays bf16 (weakly-typed 2.0), matching PyTorch semantics.
    xb, xkb, xk1b = (t.astype(jnp.bfloat16) for t in (x, xk, xk1))
    out3 = jax.block_until_ready(chebyshev_pol(xb, xkb, xk1b))
    ref3 = 2.0 * xb * xkb - xk1b
    assert out3.dtype == jnp.bfloat16
    assert jnp.allclose(out3.astype(jnp.float32), ref3.astype(jnp.float32),
                        atol=3e-2, rtol=3e-2)

    print("KERNEL_OK")
</pallas_src>

<mosaic_0001>
module attributes {stable_mosaic.version = 11 : i64} {
  func.func @_cheb_kernel(%arg0: i32, %arg1: memref<1x2048xf32, #tpu.memory_space<vmem>>, %arg2: memref<1x2048xf32, #tpu.memory_space<vmem>>, %arg3: memref<1x2048xf32, #tpu.memory_space<vmem>>, %arg4: memref<1x2048xf32, #tpu.memory_space<vmem>>) attributes {dimension_semantics = [#tpu.dimension_semantics<parallel>], iteration_bounds = array<i64: 1>, scalar_prefetch = 0 : i64, scratch_operands = 0 : i64, tpu.core_type = #tpu.core_type<tc>, window_params = [{transform_indices = @transform_0, window_bounds = array<i64: 1, 2048>}, {transform_indices = @transform_1, window_bounds = array<i64: 1, 2048>}, {transform_indices = @transform_2, window_bounds = array<i64: 1, 2048>}, {transform_indices = @transform_3, window_bounds = array<i64: 1, 2048>}]} {
    %c0 = arith.constant 0 : index
    %c0_0 = arith.constant 0 : index
    %0 = vector.load %arg1[%c0, %c0_0] : memref<1x2048xf32, #tpu.memory_space<vmem>>, vector<1x2048xf32>
    %cst = arith.constant 2.000000e+00 : f32
    %1 = vector.broadcast %cst : f32 to vector<1x2048xf32>
    %2 = arith.mulf %1, %0 : vector<1x2048xf32>
    %c0_1 = arith.constant 0 : index
    %c0_2 = arith.constant 0 : index
    %3 = vector.load %arg2[%c0_1, %c0_2] : memref<1x2048xf32, #tpu.memory_space<vmem>>, vector<1x2048xf32>
    %4 = arith.mulf %2, %3 : vector<1x2048xf32>
    %c0_3 = arith.constant 0 : index
    %c0_4 = arith.constant 0 : index
    %5 = vector.load %arg3[%c0_3, %c0_4] : memref<1x2048xf32, #tpu.memory_space<vmem>>, vector<1x2048xf32>
    %6 = arith.subf %4, %5 : vector<1x2048xf32>
    %c0_5 = arith.constant 0 : index
    %c0_6 = arith.constant 0 : index
    %7 = vector.load %arg4[%c0_5, %c0_6] : memref<1x2048xf32, #tpu.memory_space<vmem>>, vector<1x2048xf32>
    tpu.vector_store %arg4[%c0_5, %c0_6], %6 {strides = array<i32>} : memref<1x2048xf32, #tpu.memory_space<vmem>>, vector<1x2048xf32>,
    return
  }
  func.func @transform_0(%arg0: i32) -> (i32, i32) {
    %c0_i32 = arith.constant 0 : i32
    %c0_i32_0 = arith.constant 0 : i32
    return %arg0, %c0_i32 : i32, i32
  }
  func.func @transform_1(%arg0: i32) -> (i32, i32) {
    %c0_i32 = arith.constant 0 : i32
    %c0_i32_0 = arith.constant 0 : i32
    return %arg0, %c0_i32 : i32, i32
  }
  func.func @transform_2(%arg0: i32) -> (i32, i32) {
    %c0_i32 = arith.constant 0 : i32
    %c0_i32_0 = arith.constant 0 : i32
    return %arg0, %c0_i32 : i32, i32
  }
  func.func @transform_3(%arg0: i32) -> (i32, i32) {
    %c0_i32 = arith.constant 0 : i32
    %c0_i32_0 = arith.constant 0 : i32
    return %arg0, %c0_i32 : i32, i32
  }
}

</mosaic_0001>

<bundles_post_ra>
// kernel: tpu_custom_call.1
= control target key start
LH: loop header
LB: loop body
LE: loop exit
PB: predicated region body
PF: predicated region fallthrough
CT: control target
= control target key end

     0   :  { %8 = vsyncpa [#allocation3], 0  ;;  %s206_s0 = inlined_call_operand.hbm [shape: f32[1,2048], index: 0, kind: input, shape index: {}]   ;;  %s207_s1 = inlined_call_operand.hbm [shape: f32[1,2048], index: 1, kind: input, shape index: {}]   ;;  %s208_s2 = inlined_call_operand.hbm [shape: f32[1,2048], index: 2, kind: input, shape index: {}]   ;;  %s209_s3 = inlined_call_operand.hbm [shape: f32[1,2048], index: 3, kind: output, shape index: {}]  }
   0x1   :  { %9 = vsyncpa [#allocation6], 0 }
   0x2   :  { %10 = vsyncpa [#allocation4], 0  ;;  %s170_s12 = smov [#allocation5]   ;;  %s171_s14 = smov [#allocation2]  }
   0x3   :  { %s27_s13 = sshll.u32 %s170_s12, 4  ;;  %s17_s15 = sshll.u32 %s171_s14, 4  ;;  %s28_s13 = int_to_ptr.vmem [resolvable:$true] %s27_s13  ;;  %s18_s15 = int_to_ptr.vmem [resolvable:$true] %s17_s15 }
   0x4   :  { %s92_s16 = scalar_lea.vmem %s28_s13, 256  ;;  %p97_p1 = scmp.lt.s32.totalorder %s28_s13, %s28_s13 }
   0x5   :  { %p93_p0 = scmp.ne.s32.totalorder %s28_s13, %s92_s16  ;;  %p98_p2 = scmp.lt.s32.totalorder %s92_s16, %s92_s16 }
   0x7   :  { %p99_p3 = por %p98_p2, %p97_p1 }
   0x9   :  { %p100_p4 = pnand %p99_p3, %p93_p0 }
   0xb   :  { %103 = shalt.err (!%p100_p4)
}
   0xc   :  { %30 = dma.hbm_to_vmem [thread:$0]  %s207_s1, 256, %s28_s13, [#allocation6]  }
   0xd   :  { %s112_s19 = scalar_lea.vmem %s18_s15, 256  ;;  %p117_p6 = scmp.lt.s32.totalorder %s18_s15, %s18_s15 }
   0xe   :  { %p113_p5 = scmp.ne.s32.totalorder %s18_s15, %s112_s19  ;;  %p118_p7 = scmp.lt.s32.totalorder %s112_s19, %s112_s19 }
  0x10   :  { %p119_p8 = por %p118_p7, %p117_p6 }
  0x12   :  { %p120_p9 = pnand %p119_p8, %p113_p5 }
  0x14   :  { %123 = shalt.err (!%p120_p9)
}
  0x15   :  { %20 = dma.hbm_to_vmem [thread:$0]  %s206_s0, 256, %s18_s15, [#allocation3]  }
  0x16   :  { %s172_s22 = smov [#allocation7]  }
  0x17   :  { %s37_s23 = sshll.u32 %s172_s22, 4  ;;  %s38_s23 = int_to_ptr.vmem [resolvable:$true] %s37_s23 }
  0x18   :  { %s132_s24 = scalar_lea.vmem %s38_s23, 256  ;;  %p137_p11 = scmp.lt.s32.totalorder %s38_s23, %s38_s23 }
  0x19   :  { %p133_p10 = scmp.ne.s32.totalorder %s38_s23, %s132_s24  ;;  %p138_p12 = scmp.lt.s32.totalorder %s132_s24, %s132_s24 }
  0x1b   :  { %p139_p13 = por %p138_p12, %p137_p11 }
  0x1d   :  { %p140_p0 = pnand %p139_p13, %p133_p10 }
  0x1f   :  { %143 = shalt.err (!%p140_p0)
}
  0x20   :  { %40 = dma.hbm_to_vmem [thread:$0]  %s208_s2, 256, %s38_s23, [#allocation6]  }
  0x21   :  { %164 = dma.done.wait [#allocation3], 256  }
  0x22   :  { %165 = vsyncadd [#allocation3], 4294967040 }
  0x23   :  { %166 = dma.done.wait [#allocation6], 512  }
  0x24   :  { %167 = vsyncadd [#allocation6], 4294966784  ;;  %v50_v0 = vld [vmem:[#allocation2] sm:$0xff]  ;;  %v54_v1 = vld [vmem:[#allocation5] sm:$0xff]  ;;  %s173_s0 = smov [#allocation8]  }
  0x25   :  { %v52_v2 = vmul.f32 2.0, %v50_v0  ;;  %v51_v3 = vld [vmem:[#allocation2 + $0x8] sm:$0xff]  ;;  %v55_v4 = vld [vmem:[#allocation5 + $0x8] sm:$0xff]  ;;  %v58_v5 = vld [vmem:[#allocation7] sm:$0xff]  ;;  %s70_s26 = sshll.u32 %s173_s0, 4  ;;  %s71_s26 = int_to_ptr.vmem [resolvable:$true] %s70_s26 }
  0x26   :  { %v53_v6 = vmul.f32 2.0, %v51_v3  ;;  %v59_v8 = vld [vmem:[#allocation7 + $0x8] sm:$0xff]  ;;  %s144_s2 = scalar_lea.vmem %s71_s26, 256  ;;  %p149_p2 = scmp.lt.s32.totalorder %s71_s26, %s71_s26 }
  0x27   :  { %v56_v7 = vmul.f32 %v54_v1, %v52_v2  ;;  %p145_p1 = scmp.ne.s32.totalorder %s71_s26, %s144_s2  ;;  %p150_p3 = scmp.lt.s32.totalorder %s144_s2, %s144_s2 }
  0x28   :  { %v57_v9 = vmul.f32 %v55_v4, %v53_v6 }
  0x29   :  { %v60_v10 = vsub.f32 %v56_v7, %v58_v5  ;;  %p151_p4 = por %p150_p3, %p149_p2 }
  0x2a   :  { %v61_v11 = vsub.f32 %v57_v9, %v59_v8 }
  0x2b   :  { %62 = vst [vmem:[#allocation8] sm:$0xff] %v60_v10  ;;  %p152_p5 = pnand %p151_p4, %p145_p1 }
  0x2c   :  { %63 = vst [vmem:[#allocation8 + $0x8] sm:$0xff] %v61_v11 }
  0x2d   :  { %155 = shalt.err (!%p152_p5)
}
  0x2e   :  { %73 = dma.vmem_to_hbm [thread:$0]  %s71_s26, 256, %s209_s3, [#allocation4]  }
  0x2f   :  { %168 = dma.done.wait [#allocation4], 256  }
  0x30   :  { %169 = vsyncadd [#allocation4], 4294967040 }
  0x31   :  { %77 = vsyncpa [#allocation3], 1 }
  0x32   :  { %78 = vsyncpa [#allocation6], 1 }
  0x33   :  { %79 = vsyncpa [#allocation4], 1 }

</bundles_post_ra>
